<compile_context>
chip_gen: v7x
topology: tpu7x:2x2x1
jax: 0.10.0
libtpu: 0.0.40
codegen_flags: <defaults>
</compile_context>

<pallas_src>
import functools

import jax
import jax.numpy as jnp
from jax import lax
from jax.experimental import pallas as pl
from jax.experimental.pallas import tpu as pltpu


def _vmem_capacity_bytes():
    """Physical VMEM per TensorCore, with a v7x-safe fallback."""
    try:
        info = pltpu.get_tpu_info()
        cap = getattr(info, "vmem_capacity_bytes", None)
        if cap:
            return int(cap)
    except Exception:
        pass
    return 64 * 1024 * 1024        # v7x per-TC size; conservative for v5e/v6e


def _choose_channel_tile(B, C, D, itemsize, budget_bytes, min_tiles=2):
    """Largest channel tile whose working set fits `budget_bytes`, but with at
    least `min_tiles` grid steps (megacore sharding + DMA/compute overlap)."""
    n = 2 * B
    # Per channel: double-buffered src/tgt input blocks (2 tensors x 2 bufs),
    # the (2B, D) concat scratch, and ~6 live (2B, 2B) f32 intermediates
    # (gram, masked gram, l2, exp, kernel accumulator, slack).
    per_channel = (4 * B * D + 2 * B * D) * itemsize + 6 * n * n * 4
    max_ct = max(1, budget_bytes // per_channel)
    ct = min(C, max_ct)
    if C >= min_tiles:
        ct = min(ct, (C + min_tiles - 1) // min_tiles)
    return max(1, int(ct))


def _mmd_rbf_tile_kernel(src_ref, tgt_ref, out_ref, u_ref, *,
                         kernel_mul, kernel_num, fix_sigma):
    """RBF-MMD for one tile of channels; writes per-channel losses (CT,1,1)."""
    ct, b, d = src_ref.shape
    n = 2 * b

    # Assemble the concatenated slab in the inputs' native dtype (no up-cast
    # of the big (CT,B,D) slabs; the MXU accumulates in f32 below).
    u_ref[:, :b, :] = src_ref[...]
    u_ref[:, b:, :] = tgt_ref[...]
    u = u_ref[...]                                           # (CT, 2B, D)

    # One fused batched Gram per channel on the MXU: (CT, 2B, 2B), f32 acc.
    gram = jnp.einsum('cnd,cmd->cnm', u, u,
                      preferred_element_type=jnp.float32)

    # Squared norms from the Gram diagonal via an iota mask (keeps the L2
    # diagonal exactly zero, matching the reference).  Single mask multiply,
    # two small XLU reductions.
    row = lax.broadcasted_iota(jnp.int32, (n, n), 0)
    col = lax.broadcasted_iota(jnp.int32, (n, n), 1)
    eye = (row == col).astype(jnp.float32)                   # (2B, 2B)
    gd = gram * eye
    sq_col = jnp.sum(gd, axis=2, keepdims=True)              # (CT, 2B, 1)
    sq_row = jnp.sum(gd, axis=1, keepdims=True)              # (CT, 1, 2B)

    # Pairwise squared distances; clamp tiny negatives from f32 cancellation.
    l2 = jnp.maximum(sq_col + sq_row - 2.0 * gram, 0.0)      # (CT, 2B, 2B)

    def _sum2(x):
        # Reduce the two minor axes, keeping a (CT, 1, 1) per-channel scalar.
        return jnp.sum(jnp.sum(x, axis=2, keepdims=True), axis=1, keepdims=True)

    mul_half = kernel_mul ** (kernel_num // 2)                # folded at trace
    if fix_sigma:  # PyTorch truthiness: fix_sigma=0.0 -> data-driven
        inv_bw0 = jnp.float32(mul_half / fix_sigma)
    else:
        l2_sum = _sum2(l2)                                    # ONE reduction
        # NOTE: identical source/target per channel -> l2_sum == 0 -> NaN,
        # the same hazard as the PyTorch reference (left unguarded).
        inv_bw0 = jnp.float32(float(n * n - n) * mul_half) / l2_sum

    # Accumulate the multi-bandwidth kernel matrix on the VPU and reduce once.
    if kernel_mul == 2.0:
        # One exp at the widest bandwidth; remaining terms by repeated
        # squaring (exp(x)^2 == exp(2x)) — keeps the single-issue EUP idle.
        scale = inv_bw0 * jnp.float32(2.0 ** (1 - kernel_num))
        e = jnp.exp(-l2 * scale)
        k_acc = e
        for _ in range(kernel_num - 1):
            e = e * e
            k_acc = k_acc + e
    else:
        k_acc = None
        for i in range(kernel_num):
            e = jnp.exp(-l2 * (inv_bw0 * jnp.float32(kernel_mul ** (-i))))
            k_acc = e if k_acc is None else k_acc + e

    # XX + YY - XY - YX == sum(sign * K) / B^2 with +1 on SS/TT, -1 on ST/TS.
    sign = jnp.where((row < b) == (col < b), 1.0, -1.0).astype(jnp.float32)
    loss_c = _sum2(k_acc * sign) * jnp.float32(1.0 / (b * b))  # (CT, 1, 1)
    out_ref[...] = loss_c


def mmd_loss(source, target, *, kernel_type='rbf', kernel_mul=2.0,
             kernel_num=5, fix_sigma=None, channel_tile=None):
    """JAX/Pallas equivalent of MMDLoss.forward(source, target)."""
    B, C, D = source.shape
    assert target.shape == (B, C, D)
    assert source.dtype == target.dtype

    if kernel_type != 'rbf':
        # TODO(synk): 'linear' kernel path (linear_mmd2) not implemented here.
        raise NotImplementedError("only kernel_type='rbf' is implemented")

    cap = _vmem_capacity_bytes()
    vmem_limit = min(int(cap * 0.75), 100 * 1024 * 1024)
    tile_budget = int(cap * 0.55)
    itemsize = jnp.dtype(source.dtype).itemsize

    ct = (channel_tile if channel_tile is not None
          else _choose_channel_tile(B, C, D, itemsize, tile_budget))
    ct = max(1, min(ct, C))
    n_tiles = (C + ct - 1) // ct
    c_pad = n_tiles * ct

    # Channel-major so channel tiles are the leading (unconstrained) block dim
    # and each block carries the full, layout-safe (B, D) slab.  With
    # allow_input_fusion the transpose can fuse into the operand read.
    src = jnp.transpose(source, (1, 0, 2))                    # (C, B, D)
    tgt = jnp.transpose(target, (1, 0, 2))                    # (C, B, D)
    if c_pad != C:
        pad = ((0, c_pad - C), (0, 0), (0, 0))
        src = jnp.pad(src, pad)
        tgt = jnp.pad(tgt, pad)

    kernel = functools.partial(
        _mmd_rbf_tile_kernel,
        kernel_mul=kernel_mul, kernel_num=kernel_num, fix_sigma=fix_sigma)

    per_channel = pl.pallas_call(
        kernel,
        out_shape=jax.ShapeDtypeStruct((c_pad, 1, 1), jnp.float32),
        grid_spec=pltpu.PrefetchScalarGridSpec(
            num_scalar_prefetch=0,
            grid=(n_tiles,),
            in_specs=[
                pl.BlockSpec((ct, B, D), lambda g: (g, 0, 0)),
                pl.BlockSpec((ct, B, D), lambda g: (g, 0, 0)),
            ],
            out_specs=pl.BlockSpec((ct, 1, 1), lambda g: (g, 0, 0)),
            scratch_shapes=[pltpu.VMEM((ct, 2 * B, D), source.dtype)],
        ),
        compiler_params=pltpu.CompilerParams(
            # Each tile writes its own output block (no carried accumulator),
            # so the channel axis shards across TensorCores (v7x megacore).
            dimension_semantics=("parallel",),
            vmem_limit_bytes=vmem_limit,
            allow_input_fusion=[True, True]),
    )(src, tgt)

    # Mean over the TRUE channels only (padded channels are dropped).
    return jnp.mean(per_channel.reshape(c_pad)[:C])


def _mmd_loss_ref(source, target, kernel_mul=2.0, kernel_num=5, fix_sigma=None):
    """Pure-JAX reference mirroring the PyTorch module (rbf path)."""
    B, C, D = source.shape
    losses = []
    for c in range(C):
        s = source[:, c, :]
        t = target[:, c, :]
        total = jnp.concatenate([s, t], axis=0)
        n = total.shape[0]
        diff = total[None, :, :] - total[:, None, :]
        l2 = jnp.sum(diff * diff, axis=2)
        if fix_sigma:
            bw = jnp.float32(fix_sigma)
        else:
            bw = jnp.sum(l2) / (n * n - n)
        bw = bw / (kernel_mul ** (kernel_num // 2))
        kern = sum(jnp.exp(-l2 / (bw * kernel_mul ** i)) for i in range(kernel_num))
        XX = jnp.mean(kern[:B, :B])
        YY = jnp.mean(kern[B:, B:])
        XY = jnp.mean(kern[:B, B:])
        YX = jnp.mean(kern[B:, :B])
        losses.append(XX + YY - XY - YX)
    return jnp.mean(jnp.stack(losses))


if __name__ == "__main__":
    key = jax.random.PRNGKey(0)
    k1, k2, k3, k4 = jax.random.split(key, 4)

    # Case 1: auto channel tile -> at least 2 grid steps (megacore / pipelining).
    B, C, D = 8, 8, 32
    source = jax.random.normal(k1, (B, C, D), dtype=jnp.float32)
    target = jax.random.normal(k2, (B, C, D), dtype=jnp.float32) + 0.5
    out = jax.block_until_ready(mmd_loss(source, target))
    ref = _mmd_loss_ref(source, target)
    assert jnp.allclose(out, ref, rtol=2e-3, atol=1e-5), (out, ref)

    # Case 2: odd channel count exercises the channel-padding path
    # (padded channels are computed but excluded from the final mean).
    B2, C2, D2 = 8, 5, 64
    s2 = jax.random.normal(k3, (B2, C2, D2), dtype=jnp.float32) * 1.5
    t2 = jax.random.normal(k4, (B2, C2, D2), dtype=jnp.float32) + 0.25
    out2 = jax.block_until_ready(mmd_loss(s2, t2, channel_tile=2))
    ref2 = _mmd_loss_ref(s2, t2)
    assert jnp.allclose(out2, ref2, rtol=2e-3, atol=1e-5), (out2, ref2)

    print("KERNEL_OK")
</pallas_src>

<mosaic_0001>
module attributes {stable_mosaic.version = 11 : i64} {
  func.func @_mmd_rbf_tile_kernel(%arg0: i32, %arg1: memref<4x8x32xf32, #tpu.memory_space<vmem>>, %arg2: memref<4x8x32xf32, #tpu.memory_space<vmem>>, %arg3: memref<4x1x1xf32, #tpu.memory_space<vmem>>, %arg4: memref<4x16x32xf32, #tpu.memory_space<vmem>>) attributes {dimension_semantics = [#tpu.dimension_semantics<parallel>], iteration_bounds = array<i64: 2>, scalar_prefetch = 0 : i64, scratch_operands = 1 : i64, tpu.core_type = #tpu.core_type<tc>, window_params = [{transform_indices = @transform_0, window_bounds = array<i64: 4, 8, 32>}, {transform_indices = @transform_1, window_bounds = array<i64: 4, 8, 32>}, {transform_indices = @transform_2, window_bounds = array<i64: 4, 1, 1>}]} {
    %c0 = arith.constant 0 : index
    %c0_0 = arith.constant 0 : index
    %c0_1 = arith.constant 0 : index
    %0 = vector.load %arg1[%c0, %c0_0, %c0_1] : memref<4x8x32xf32, #tpu.memory_space<vmem>>, vector<4x8x32xf32>
    %c0_2 = arith.constant 0 : index
    %c0_3 = arith.constant 0 : index
    %c0_4 = arith.constant 0 : index
    %1 = vector.load %arg4[%c0_2, %c0_3, %c0_4] : memref<4x16x32xf32, #tpu.memory_space<vmem>>, vector<4x8x32xf32>
    tpu.vector_store %arg4[%c0_2, %c0_3, %c0_4], %0 {strides = array<i32>} : memref<4x16x32xf32, #tpu.memory_space<vmem>>, vector<4x8x32xf32>,
    %c0_5 = arith.constant 0 : index
    %c0_6 = arith.constant 0 : index
    %c0_7 = arith.constant 0 : index
    %2 = vector.load %arg2[%c0_5, %c0_6, %c0_7] : memref<4x8x32xf32, #tpu.memory_space<vmem>>, vector<4x8x32xf32>
    %c0_8 = arith.constant 0 : index
    %c8 = arith.constant 8 : index
    %c0_9 = arith.constant 0 : index
    %3 = vector.load %arg4[%c0_8, %c8, %c0_9] : memref<4x16x32xf32, #tpu.memory_space<vmem>>, vector<4x8x32xf32>
    tpu.vector_store %arg4[%c0_8, %c8, %c0_9], %2 {strides = array<i32>} : memref<4x16x32xf32, #tpu.memory_space<vmem>>, vector<4x8x32xf32>,
    %c0_10 = arith.constant 0 : index
    %c0_11 = arith.constant 0 : index
    %c0_12 = arith.constant 0 : index
    %4 = vector.load %arg4[%c0_10, %c0_11, %c0_12] : memref<4x16x32xf32, #tpu.memory_space<vmem>>, vector<4x16x32xf32>
    "tpu.trace_start"() <{level = 10 : i32, message = "cnd,cmd->cnm"}> : () -> ()
    %cst = arith.constant dense<0.000000e+00> : vector<4x16x16xf32>
    %5 = tpu.matmul %4, %4, %cst {dimension_numbers = #tpu.dot_dimension_numbers<[2], [2], [1], [1], [0, 0, 0, 1, 1, 1], [0], [0]>} : vector<4x16x32xf32>, vector<4x16x32xf32>, vector<4x16x16xf32> -> vector<4x16x16xf32>
    "tpu.trace_stop"() : () -> ()
    %6 = tpu.iota {dimensions = array<i32: 0>} : vector<16x16xi32>
    %7 = tpu.iota {dimensions = array<i32: 1>} : vector<16x16xi32>
    %8 = arith.cmpi eq, %6, %7 : vector<16x16xi32>
    %9 = arith.extui %8 : vector<16x16xi1> to vector<16x16xi32>
    %10 = arith.sitofp %9 : vector<16x16xi32> to vector<16x16xf32>
    %11 = vector.shape_cast %10 : vector<16x16xf32> to vector<1x16x16xf32>
    %12 = vector.broadcast %11 : vector<1x16x16xf32> to vector<4x16x16xf32>
    %13 = arith.mulf %5, %12 : vector<4x16x16xf32>
    %cst_13 = arith.constant dense<0.000000e+00> : vector<4x16xf32>
    %14 = vector.multi_reduction <add>, %13, %cst_13 [2] : vector<4x16x16xf32> to vector<4x16xf32>
    %15 = vector.shape_cast %14 : vector<4x16xf32> to vector<4x16x1xf32>
    %cst_14 = arith.constant dense<0.000000e+00> : vector<4x16xf32>
    %16 = vector.multi_reduction <add>, %13, %cst_14 [1] : vector<4x16x16xf32> to vector<4x16xf32>
    %17 = vector.shape_cast %16 : vector<4x16xf32> to vector<4x1x16xf32>
    %18 = vector.broadcast %15 : vector<4x16x1xf32> to vector<4x16x16xf32>
    %19 = vector.broadcast %17 : vector<4x1x16xf32> to vector<4x16x16xf32>
    %20 = arith.addf %18, %19 : vector<4x16x16xf32>
    %cst_15 = arith.constant 2.000000e+00 : f32
    %21 = vector.broadcast %cst_15 : f32 to vector<4x16x16xf32>
    %22 = arith.mulf %21, %5 : vector<4x16x16xf32>
    %23 = arith.subf %20, %22 : vector<4x16x16xf32>
    %cst_16 = arith.constant 0.000000e+00 : f32
    %24 = vector.broadcast %cst_16 : f32 to vector<4x16x16xf32>
    %25 = arith.maximumf %23, %24 : vector<4x16x16xf32>
    %cst_17 = arith.constant dense<0.000000e+00> : vector<4x16xf32>
    %26 = vector.multi_reduction <add>, %25, %cst_17 [2] : vector<4x16x16xf32> to vector<4x16xf32>
    %27 = vector.shape_cast %26 : vector<4x16xf32> to vector<4x16x1xf32>
    %cst_18 = arith.constant dense<0.000000e+00> : vector<4x1xf32>
    %28 = vector.multi_reduction <add>, %27, %cst_18 [1] : vector<4x16x1xf32> to vector<4x1xf32>
    %29 = vector.shape_cast %28 : vector<4x1xf32> to vector<4x1x1xf32>
    %cst_19 = arith.constant 9.600000e+02 : f32
    %30 = vector.broadcast %cst_19 : f32 to vector<4x1x1xf32>
    %31 = arith.divf %30, %29 : vector<4x1x1xf32>
    %cst_20 = arith.constant 6.250000e-02 : f32
    %32 = vector.broadcast %cst_20 : f32 to vector<4x1x1xf32>
    %33 = arith.mulf %31, %32 : vector<4x1x1xf32>
    %cst_21 = arith.constant 0.000000e+00 : f32
    %34 = vector.broadcast %cst_21 : f32 to vector<4x16x16xf32>
    %35 = arith.subf %34, %25 : vector<4x16x16xf32>
    %36 = vector.broadcast %33 : vector<4x1x1xf32> to vector<4x16x16xf32>
    %37 = arith.mulf %35, %36 : vector<4x16x16xf32>
    %38 = math.exp %37 : vector<4x16x16xf32>
    %39 = arith.mulf %38, %38 : vector<4x16x16xf32>
    %40 = arith.addf %38, %39 : vector<4x16x16xf32>
    %41 = arith.mulf %39, %39 : vector<4x16x16xf32>
    %42 = arith.addf %40, %41 : vector<4x16x16xf32>
    %43 = arith.mulf %41, %41 : vector<4x16x16xf32>
    %44 = arith.addf %42, %43 : vector<4x16x16xf32>
    %45 = arith.mulf %43, %43 : vector<4x16x16xf32>
    %46 = arith.addf %44, %45 : vector<4x16x16xf32>
    %c8_i32 = arith.constant 8 : i32
    %47 = vector.broadcast %c8_i32 : i32 to vector<16x16xi32>
    %48 = arith.cmpi slt, %6, %47 : vector<16x16xi32>
    %c8_i32_22 = arith.constant 8 : i32
    %49 = vector.broadcast %c8_i32_22 : i32 to vector<16x16xi32>
    %50 = arith.cmpi slt, %7, %49 : vector<16x16xi32>
    %51 = arith.xori %48, %50 : vector<16x16xi1>
    %cst_23 = arith.constant dense<true> : vector<16x16xi1>
    %52 = arith.xori %51, %cst_23 : vector<16x16xi1>
    %cst_24 = arith.constant 1.000000e+00 : f32
    %cst_25 = arith.constant -1.000000e+00 : f32
    %53 = vector.broadcast %cst_24 : f32 to vector<16x16xf32>
    %54 = vector.broadcast %cst_25 : f32 to vector<16x16xf32>
    %55 = arith.select %52, %53, %54 : vector<16x16xi1>, vector<16x16xf32>
    %56 = vector.shape_cast %55 : vector<16x16xf32> to vector<1x16x16xf32>
    %57 = vector.broadcast %56 : vector<1x16x16xf32> to vector<4x16x16xf32>
    %58 = arith.mulf %46, %57 : vector<4x16x16xf32>
    %cst_26 = arith.constant dense<0.000000e+00> : vector<4x16xf32>
    %59 = vector.multi_reduction <add>, %58, %cst_26 [2] : vector<4x16x16xf32> to vector<4x16xf32>
    %60 = vector.shape_cast %59 : vector<4x16xf32> to vector<4x16x1xf32>
    %cst_27 = arith.constant dense<0.000000e+00> : vector<4x1xf32>
    %61 = vector.multi_reduction <add>, %60, %cst_27 [1] : vector<4x16x1xf32> to vector<4x1xf32>
    %62 = vector.shape_cast %61 : vector<4x1xf32> to vector<4x1x1xf32>
    %cst_28 = arith.constant 1.562500e-02 : f32
    %63 = vector.broadcast %cst_28 : f32 to vector<4x1x1xf32>
    %64 = arith.mulf %62, %63 : vector<4x1x1xf32>
    %c0_29 = arith.constant 0 : index
    %c0_30 = arith.constant 0 : index
    %c0_31 = arith.constant 0 : index
    %65 = vector.load %arg3[%c0_29, %c0_30, %c0_31] : memref<4x1x1xf32, #tpu.memory_space<vmem>>, vector<4x1x1xf32>
    tpu.vector_store %arg3[%c0_29, %c0_30, %c0_31], %64 {strides = array<i32>} : memref<4x1x1xf32, #tpu.memory_space<vmem>>, vector<4x1x1xf32>,
    return
  }
  func.func @transform_0(%arg0: i32) -> (i32, i32, i32) {
    %c0_i32 = arith.constant 0 : i32
    %c0_i32_0 = arith.constant 0 : i32
    %c0_i32_1 = arith.constant 0 : i32
    return %arg0, %c0_i32, %c0_i32_0 : i32, i32, i32
  }
  func.func @transform_1(%arg0: i32) -> (i32, i32, i32) {
    %c0_i32 = arith.constant 0 : i32
    %c0_i32_0 = arith.constant 0 : i32
    %c0_i32_1 = arith.constant 0 : i32
    return %arg0, %c0_i32, %c0_i32_0 : i32, i32, i32
  }
  func.func @transform_2(%arg0: i32) -> (i32, i32, i32) {
    %c0_i32 = arith.constant 0 : i32
    %c0_i32_0 = arith.constant 0 : i32
    %c0_i32_1 = arith.constant 0 : i32
    return %arg0, %c0_i32, %c0_i32_0 : i32, i32, i32
  }
}

</mosaic_0001>

<bundles_post_ra>
// kernel: tpu_custom_call.1
= control target key start
LH: loop header
LB: loop body
LE: loop exit
PB: predicated region body
PF: predicated region fallthrough
CT: control target
= control target key end

     0   :  { %7 = vsyncpa [#allocation4], 0  ;;  %s1581_s0 = inlined_call_operand.hbm [shape: f32[8,8,32], index: 0, kind: input, shape index: {}]   ;;  %s1582_s1 = inlined_call_operand.hbm [shape: f32[8,8,32], index: 1, kind: input, shape index: {}]   ;;  %s1583_s2 = inlined_call_operand.vmem [shape: f32[8,1,1], index: 2, kind: output, shape index: {}]  }
   0x1   :  { %9 = vsyncpa [#allocation4 + $0x1], 0 }
   0x2   :  { %10 = vsyncpa [#allocation6], 0 }
   0x3   :  { %12 = vsyncpa [#allocation6 + $0x1], 0  ;;  %s1279_s9 = smov 0   ;;  %s1281_s10 = smov 0  }
   0x4   :  { %s1283_s11 = smov 0   ;;  %s1285_s12 = smov 0  }
   0x5 LB: > { %s980_s13 = sadd.s32 4294967295, %s1255_s12   ;;  %s1299_s14 = sadd.s32 1, %s1255_s12   ;;  %s1255_s12 = sphi %s1285_s12, %s1595_s12   ;;  %s1251_s11 = sphi %s1283_s11, %s1594_s11   ;;  %s1247_s10 = sphi %s1281_s10, %s1593_s10   ;;  %s1243_s9 = sphi %s1279_s9, %s1592_s9  }
   0x6   : > { %s22_s15 = ssub.s32 %s1255_s12, %s1299_s14  ;;  %s25_s16 = sadd.s32 1, %s1251_s11 }
   0x7   : > { %p23_p0 = scmp.eq.s32.totalorder %s22_s15, 0  ;;  %p32_p1 = scmp.ne.s32.totalorder %s1251_s11, %s1247_s10 }
   0x8   : > { %p33_p2 = scmp.eq.s32.totalorder %s1255_s12, 0  ;;  %p38_p3 = scmp.ne.s32.totalorder %s1247_s10, %s1243_s9 }
   0x9   : > { %s1309_s17 = scalar_select %p23_p0, %s1251_s11, %s25_s16  }
   0xa   : > { %p34_p4 = por %p33_p2, %p32_p1  ;;  %p39_p5 = scmp.eq.s32.totalorder %s980_s13, 0 }
   0xb   : > { %p1095_p6 = scmp.lt.s32.totalorder %s1255_s12, 2  ;;  %s1319_s19 = sand.u32 1, %s1251_s11  }
   0xc   : > { %p1314_p7 = por %p39_p5, %p38_p3  ;;  %s984_s20 = sshll.u32 %s1319_s19, 5 }
   0xd   : > { %s1014_s21 = sshll.u32 %s1255_s12, 9  ;;  %s118_s25 = scalar_lea.vmem [#allocation3], %s984_s20 }
   0xe   : > { %s1585_s18 = scalar_select %p1314_p7, 1, 0 }
   0xf   : > { %s1328_s24 = scalar_lea.hbm %s1581_s0, %s1014_s21  ;;  %s125_s26 = sshll.u32 %s118_s25, 4  ;;  %s1332_s26 = int_to_ptr.vmem [resolvable:$true] %s125_s26 }
  0x10   : > { %p1334_p8 = pnand %p1095_p6, %p34_p4  ;;  %s115_s28 = scalar_lea.sflag [#allocation4], %s1319_s19 }
  0x11   : > { %s1157_s29 = scalar_lea.hbm %s1328_s24, 512  ;;  %s1162_s4 = scalar_lea.hbm %s1581_s0, 1024 }
  0x12   : > { %p1158_p10 = scmp.ne.s32.totalorder %s1328_s24, %s1157_s29  ;;  %p1159_p11 = pneg %p1334_p8 }
  0x13   : > { %p1163_p0 = scmp.lt.u32.totalorder %s1328_s24, %s1581_s0  ;;  %p1164_p1 = scmp.lt.u32.totalorder %s1162_s4, %s1157_s29 }
  0x14   : > { %p1160_p12 = pnand %p1159_p11, %p1158_p10  ;;  %p1166_p3 = scmp.lt.u32.totalorder %s1157_s29, %s1328_s24 }
  0x15   : > { %p1165_p2 = por %p1164_p1, %p1163_p0 }
  0x16   : > { %p1161_p13 = pneg %p1160_p12 }
  0x17   : > { %p1167_p4 = por %p1166_p3, %p1165_p2 }
  0x19   : > { %p1168_p5 = pnand %p1167_p4, %p1161_p13 }
  0x1b   : > { %1171 = shalt.err (!%p1168_p5)
}
  0x1c   : > { %s1172_s7 = scalar_lea.vmem %s1332_s26, 512  ;;  %s1257_s8 = smov [#allocation3]  }
  0x1d   : > { %p1173_p6 = scmp.ne.s32.totalorder %s1332_s26, %s1172_s7  ;;  %s1177_s9 = sshll.u32 %s1257_s8, 4  ;;  %s1178_s9 = int_to_ptr.vmem [resolvable:$false] %s1177_s9 }
  0x1e   : > { %s1179_s15 = scalar_lea.vmem %s1178_s9, 1024  ;;  %p1180_p9 = scmp.lt.s32.totalorder %s1332_s26, %s1178_s9 }
  0x1f   : > { %p1175_p10 = pnand %p1173_p6, %p1159_p11  ;;  %p1181_p0 = scmp.lt.s32.totalorder %s1179_s15, %s1172_s7 }
  0x21   : > { %p1176_p12 = pneg %p1175_p10  ;;  %p1182_p1 = por %p1181_p0, %p1180_p9 }
  0x23   : > { %p1183_p2 = pnand %p1182_p1, %p1176_p12 }
  0x25   : > { %1186 = shalt.err (!%p1183_p2)
}
  0x26   : > { %s1258_s16 = smov 128   ;;  %s1259_s22 = smov 8  }
  0x27   : > { %1091 = dma.hbm_to_vmem [thread:$0]  (!%p1334_p8), %s1328_s24, 512, %s1332_s26, %s115_s28, %s1258_s16, %s1258_s16, %s1259_s22  }
  0x28   : > { %p154_p9 = scmp.lt.s32.totalorder %s1255_s12, 3  ;;  %s1376_s29 = scalar_lea.hbm %s1582_s1, %s1014_s21 }
  0x29   : > { %p1587_p13 = scmp.ge.s32.totalorder %s1255_s12, 1  ;;  %s139_s3 = scalar_lea.vmem [#allocation5], %s984_s20 }
  0x2a   : > { %s146_s4 = sshll.u32 %s139_s3, 4  ;;  %s136_s24 = scalar_lea.sflag [#allocation6], %s1319_s19  ;;  %s1386_s4 = int_to_ptr.vmem [resolvable:$true] %s146_s4 }
  0x2b   : > { %p1380_p3 = pnand %p1587_p13, %p154_p9  ;;  %s1187_s26 = scalar_lea.hbm %s1376_s29, 512 }
  0x2c   : > { %p1188_p4 = scmp.ne.s32.totalorder %s1376_s29, %s1187_s26  ;;  %s1192_s5 = scalar_lea.hbm %s1582_s1, 1024 }
  0x2d   : > { %p1193_p10 = scmp.lt.u32.totalorder %s1376_s29, %s1582_s1  ;;  %p1194_p12 = scmp.lt.u32.totalorder %s1192_s5, %s1187_s26 }
  0x2e   : > { %p1190_p5 = pnand %p1188_p4, %p1159_p11  ;;  %p1196_p1 = scmp.lt.u32.totalorder %s1187_s26, %s1376_s29 }
  0x2f   : > { %p1195_p0 = por %p1194_p12, %p1193_p10 }
  0x30   : > { %p1191_p6 = pneg %p1190_p5 }
  0x31   : > { %p1197_p2 = por %p1196_p1, %p1195_p0 }
  0x33   : > { %p1198_p9 = pnand %p1197_p2, %p1191_p6 }
  0x35   : > { %1201 = shalt.err (!%p1198_p9)
}
  0x36   : > { %s1202_s20 = scalar_lea.vmem %s1386_s4, 512  ;;  %s1260_s8 = smov [#allocation5]  }
  0x37   : > { %p1203_p13 = scmp.ne.s32.totalorder %s1386_s4, %s1202_s20  ;;  %s1207_s9 = sshll.u32 %s1260_s8, 4  ;;  %s1208_s9 = int_to_ptr.vmem [resolvable:$false] %s1207_s9 }
  0x38   : > { %s1209_s15 = scalar_lea.vmem %s1208_s9, 1024  ;;  %p1210_p7 = scmp.lt.s32.totalorder %s1386_s4, %s1208_s9 }
  0x39   : > { %p1205_p4 = pnand %p1203_p13, %p1159_p11  ;;  %p1211_p10 = scmp.lt.s32.totalorder %s1209_s15, %s1202_s20 }
  0x3b   : > { %p1206_p5 = pneg %p1205_p4  ;;  %p1212_p12 = por %p1211_p10, %p1210_p7 }
  0x3d   : > { %p1213_p0 = pnand %p1212_p12, %p1206_p5 }
  0x3f   : > { %1216 = shalt.err (!%p1213_p0)
}
  0x40   : > { %1094 = dma.hbm_to_vmem [thread:$0]  (!%p1334_p8), %s1376_s29, 512, %s1386_s4, %s136_s24, %s1258_s16, %s1258_s16, %s1259_s22  }
  0x41   : > { %158 = sbr.rel (%p1380_p3) target bundleno = 838 (0x346), region = 28  ;;  %s160_s23 = sand.u32 (!%p1380_p3), 1, %s1247_s10  }
  0x42   : > { %s991_s25 = sshll.u32 (!%p1380_p3), %s160_s23, 5  ;;  %s161_s3 = scalar_lea.sflag (!%p1380_p3), [#allocation4], %s160_s23 }
  0x43   : > { %s164_s26 = scalar_lea.vmem (!%p1380_p3), [#allocation3], %s991_s25  ;;  %p1589_p7 = scmp.ne.s32.totalorder (!%p1380_p3), %s1585_s18, 0 }
  0x48   : > { %1234 = dma.done.wait (%p1589_p7), %s161_s3, 512  }
  0x49   : > { %1236 = vsyncadd (%p1589_p7), %s161_s3, 4294966784  ;;  %s170_s27 = scalar_lea.sflag [#allocation6], %s160_s23  ;;  %s173_s19 = scalar_lea.vmem [#allocation5], %s991_s25 }
  0x4a   : > { %1238 = dma.done.wait (%p1589_p7), %s170_s27, 512  }
  0x4b   : > { %1240 = vsyncadd (%p1589_p7), %s170_s27, 4294966784  ;;  %vm209_vm0 = vcmask 261120   ;;  %v205_v0 = vld [vmem:[%s164_s26] sm:$0xff]  ;;  %v206_v2 = vld [vmem:[%s164_s26 + $0x8] sm:$0xff]  ;;  %v554_v21 = vlaneseq  ;;  %v1261_v25 = vmov 0.0   ;;  %vm573_vm4 = vcmask 130048  }
  0x4c   : > { %v214_v1 = vld [vmem:[%s173_s19] sm:$0xff]  ;;  %210 = vst.msk [vmem:[#allocation2] sm:$0xff] %vm209_vm0, %v205_v0  ;;  %211 = vst.msk [vmem:[#allocation2 + $0x10] sm:$0xff] %vm209_vm0, %v206_v2  ;;  %v215_v3 = vld [vmem:[%s173_s19 + $0x8] sm:$0xff]  ;;  %vm1262_vm6 = vmmov 1   ;;  %s993_s18 = sshll.u32 %s980_s13, 2 }
  0x4d   : > { %218 = vst.msk [vmem:[#allocation2 + $0x8] sm:$0xff] %vm209_vm0, %v214_v1  ;;  %v207_v4 = vld [vmem:[%s164_s26 + $0x10] sm:$0xff]  ;;  %219 = vst.msk [vmem:[#allocation2 + $0x18] sm:$0xff] %vm209_vm0, %v215_v3  ;;  %v208_v6 = vld [vmem:[%s164_s26 + $0x18] sm:$0xff]  ;;  %v555_v22 = vshrl.u32 %v554_v21, 7  ;;  %v1466_v24 = vand.u32 127, %v554_v21 }
  0x4e   : > { %v216_v5 = vld [vmem:[%s173_s19 + $0x10] sm:$0xff]  ;;  %212 = vst.msk [vmem:[#allocation2 + $0x20] sm:$0xff] %vm209_vm0, %v207_v4  ;;  %v217_v7 = vld [vmem:[%s173_s19 + $0x18] sm:$0xff]  ;;  %213 = vst.msk [vmem:[#allocation2 + $0x30] sm:$0xff] %vm209_vm0, %v208_v6  ;;  %p201_p8 = scmp.lt.s32.totalorder %s993_s18, 7  ;;  %vm891_vm10 = vcmask 0  }
  0x4f   : > { %220 = vst.msk [vmem:[#allocation2 + $0x28] sm:$0xff] %vm209_vm0, %v216_v5  ;;  %221 = vst.msk [vmem:[#allocation2 + $0x38] sm:$0xff] %vm209_vm0, %v217_v7  ;;  %v556_v23 = vadd.s32 8, %v555_v22  ;;  %vm559_vm3 = vcmp.eq.s32.totalorder %v555_v22, %v1466_v24  ;;  %vm820_vm5 = vcmp.lt.s32.totalorder %v1466_v24, 8 }
  0x50   : > { %vm1438_vm1 = vmpackc.low %vm209_vm0, %vm209_vm0  ;;  %v1010_v27 = vsel %vm559_vm3, 1.0, %v1261_v25  ;;  %s1597_s18 = smov (!%p201_p8, %s993_s18), 7 }
  0x51   : > { %vm560_vm2 = vcmp.eq.s32.totalorder %v556_v23, %v1466_v24  ;;  %vm821_vm7 = vmxor %vm1262_vm6, %vm820_vm5  ;;  %s203_s16 = scalar_lea.vmem %s1583_s2, %s1597_s18 }
  0x52   : > { %v1011_v26 = vsel %vm560_vm2, 1.0, %v1261_v25  ;;  %vm824_vm8 = vmxor %vm820_vm5, %vm1262_vm6 }
  0x53   : > { %v222_v9 = vld [vmem:[#allocation2] sm:$0xff]  ;;  %v224_v11 = vld [vmem:[#allocation2 + $0x10] sm:$0xff]  ;;  %vm823_vm9 = vmxor %vm821_vm7, %vm1262_vm6 }
  0x54   : > { %v223_v10 = vld [vmem:[#allocation2 + $0x8] sm:$0xff]  ;;  %v225_v13 = vld [vmem:[#allocation2 + $0x18] sm:$0xff]  ;;  %1036 = vmatprep.mubr.msk.f32.mxu0 %vm209_vm0, %v222_v9  ;;  %1043 = vmatprep.mubr.msk.f32.mxu1 %vm209_vm0, %v224_v11 }
  0x55   : > { %v1060_v12 = vpack.c.bf16 %v223_v10, %v222_v9  ;;  %v226_v14 = vld [vmem:[#allocation2 + $0x20] sm:$0xff]  ;;  %v1066_v16 = vpack.c.bf16 %v225_v13, %v224_v11  ;;  %v228_v18 = vld [vmem:[#allocation2 + $0x30] sm:$0xff] }
  0x56   : > { %v227_v15 = vld [vmem:[#allocation2 + $0x28] sm:$0xff]  ;;  %v229_v19 = vld [vmem:[#allocation2 + $0x38] sm:$0xff] }
  0x57   : > { %v1072_v17 = vpack.c.bf16 %v227_v15, %v226_v14  ;;  %1062 = vmatprep.subr.msk.bf16.mxu0 %vm1438_vm1, %v1060_v12  ;;  %v1078_v20 = vpack.c.bf16 %v229_v19, %v228_v18  ;;  %1068 = vmatprep.subr.msk.bf16.mxu1 %vm1438_vm1, %v1066_v16 }
  0x58   : > { %1065 = vmatpush3.bf16.xpose.msk.msra.mxu0 %vm1438_vm1, %v1060_v12  ;;  %1071 = vmatpush3.bf16.xpose.msk.msra.mxu1 %vm1438_vm1, %v1066_v16 }
  0x59   : > { %1074 = vmatprep.subr.msk.bf16.mxu0 %vm1438_vm1, %v1072_v17  ;;  %1080 = vmatprep.subr.msk.bf16.mxu1 %vm1438_vm1, %v1078_v20 }
  0x5f   : > { %1037 = vmatmul.mubr.msk.f32.vlgmr.msra.gmra.mrb[0].mxu0 %vm209_vm0, %v223_v10  ;;  %1044 = vmatmul.mubr.msk.f32.vlgmr.msra.gmra.mrb[0].mxu1 %vm209_vm0, %v225_v13 }
  0x60   : > { %1077 = vmatpush3.bf16.xpose.msk.msra.mxu0 %vm1438_vm1, %v1072_v17  ;;  %1083 = vmatpush3.bf16.xpose.msk.msra.mxu1 %vm1438_vm1, %v1078_v20 }
  0x61   : > { %1050 = vmatprep.mubr.msk.f32.mxu0 %vm209_vm0, %v226_v14  ;;  %1057 = vmatprep.mubr.msk.f32.mxu1 %vm209_vm0, %v228_v18 }
  0x67   : > { %1051 = vmatmul.mubr.msk.f32.vlgmr.msra.gmra.mrb[2].mxu0 %vm209_vm0, %v227_v15  ;;  %1058 = vmatmul.mubr.msk.f32.vlgmr.msra.gmra.mrb[2].mxu1 %vm209_vm0, %v229_v19 }
 0x132   : > { %v1038_v28 = vpop.f32.mrb[0].mxu0  ;;  %v1045_v30 = vpop.f32.mrb[0].mxu1 }
 0x133   : > { %v566_v29 = vmul.f32 %v1038_v28, %v1011_v26  ;;  %v1470_v31 = vpop.f32.mrb[1].mxu0  ;;  %v568_v32 = vmul.f32 %v1045_v30, %v1011_v26  ;;  %v1473_v34 = vpop.f32.mrb[1].mxu1  ;;  %v635_v12 = vmul.f32 2.0, %v1038_v28  ;;  %v637_v15 = vmul.f32 2.0, %v1045_v30 }
 0x134   : > { %v565_v33 = vmul.f32 %v1010_v27, %v1470_v31  ;;  %v567_v35 = vmul.f32 %v1010_v27, %v1473_v34  ;;  %v634_v22 = vmul.f32 2.0, %v1470_v31 }
 0x135   : > { %v577_v36 = vsel %vm573_vm4, %v566_v29, 0.0  ;;  %v583_v37 = vsel %vm573_vm4, %v568_v32, 0.0 }
 0x136   : > { %578 = vadd.xlane.f32.xlu0 %v577_v36  ;;  %v574_v38 = vsel %vm573_vm4, %v565_v33, 0.0  ;;  %584 = vadd.xlane.f32.xlu1 %v583_v37  ;;  %v580_v39 = vsel %vm573_vm4, %v567_v35, 0.0 }
 0x137   : > { %v598_v40 = vadd.f32 %v577_v36, %v574_v38  ;;  %v605_v41 = vadd.f32 %v583_v37, %v580_v39 }
 0x139   : > { %v599_v56 = vrot.slane %v598_v40, 4  ;;  %v606_v57 = vrot.slane %v605_v41, 4 }
 0x13a   : > { %575 = vadd.xlane.f32.xlu0 %v574_v38  ;;  %v1480_v42 = vpop.f32.mrb[2].mxu0  ;;  %581 = vadd.xlane.f32.xlu1 %v580_v39  ;;  %v1482_v43 = vpop.f32.mrb[2].mxu1 }
 0x13b   : > { %v570_v44 = vmul.f32 %v1480_v42, %v1011_v26  ;;  %v464_v45 = vpop.f32.mrb[3].mxu0  ;;  %v572_v46 = vmul.f32 %v1482_v43, %v1011_v26  ;;  %v1486_v48 = vpop.f32.mrb[3].mxu1  ;;  %v600_v58 = vadd.f32 %v599_v56, %v598_v40  ;;  %v607_v59 = vadd.f32 %v606_v57, %v605_v41 }
 0x13c   : > { %v569_v47 = vmul.f32 %v1010_v27, %v464_v45  ;;  %v571_v49 = vmul.f32 %v1010_v27, %v1486_v48  ;;  %v636_v27 = vmul.f32 2.0, %v1473_v34  ;;  %v639_v39 = vmul.f32 2.0, %v1480_v42 }
 0x13d   : > { %v589_v50 = vsel %vm573_vm4, %v570_v44, 0.0  ;;  %v595_v52 = vsel %vm573_vm4, %v572_v46, 0.0  ;;  %v601_v60 = vrot.slane %v600_v58, 2  ;;  %v608_v61 = vrot.slane %v607_v59, 2 }
 0x13e   : > { %v586_v51 = vsel %vm573_vm4, %v569_v47, 0.0  ;;  %590 = vadd.xlane.f32.xlu1 %v589_v50  ;;  %v592_v54 = vsel %vm573_vm4, %v571_v49, 0.0  ;;  %v638_v40 = vmul.f32 2.0, %v464_v45  ;;  %v640_v45 = vmul.f32 2.0, %v1486_v48 }
 0x13f   : > { %587 = vadd.xlane.f32.xlu0 %v586_v51  ;;  %v612_v53 = vadd.f32 %v589_v50, %v586_v51  ;;  %v619_v55 = vadd.f32 %v595_v52, %v592_v54  ;;  %v602_v63 = vadd.f32 %v601_v60, %v600_v58  ;;  %v609_v2 = vadd.f32 %v608_v61, %v607_v59 }
 0x141   : > { %v613_v62 = vrot.slane %v612_v53, 4  ;;  %v620_v1 = vrot.slane %v619_v55, 4  ;;  %v603_v3 = vrot.slane %v602_v63, 1  ;;  %v610_v6 = vrot.slane %v609_v2, 1 }
 0x142   : > { %596 = vadd.xlane.f32.xlu1 %v595_v52  ;;  %v641_v52 = vmul.f32 2.0, %v1482_v43 }
 0x143   : > { %593 = vadd.xlane.f32.xlu0 %v592_v54  ;;  %v614_v0 = vadd.f32 %v613_v62, %v612_v53  ;;  %v621_v5 = vadd.f32 %v620_v1, %v619_v55  ;;  %v604_v7 = vadd.f32 %v603_v3, %v602_v63  ;;  %v611_v9 = vadd.f32 %v610_v6, %v609_v2 }
 0x145   : > { %v615_v4 = vrot.slane %v614_v0, 2  ;;  %v622_v8 = vrot.slane %v621_v5, 2 }
 0x147   : > { %v616_v11 = vadd.f32 %v615_v4, %v614_v0  ;;  %v623_v21 = vadd.f32 %v622_v8, %v621_v5 }
 0x149   : > { %v617_v20 = vrot.slane %v616_v11, 1  ;;  %v624_v36 = vrot.slane %v623_v21, 1 }
 0x14b   : > { %v618_v35 = vadd.f32 %v617_v20, %v616_v11  ;;  %v625_v51 = vadd.f32 %v624_v36, %v623_v21 }
 0x1c3   : > { %v579_v10 = vpop.xlane.xlu0 %578  ;;  %v585_v13 = vpop.xlane.xlu1 %584 }
 0x1c4   : > { %v627_v14 = vadd.f32 %v604_v7, %v579_v10  ;;  %v629_v16 = vadd.f32 %v611_v9, %v585_v13 }
 0x1c6   : > { %v643_v17 = vsub.f32 %v627_v14, %v635_v12  ;;  %v645_v18 = vsub.f32 %v629_v16, %v637_v15 }
 0x1c7   : > { %v576_v19 = vpop.xlane.xlu0 %575  ;;  %v582_v23 = vpop.xlane.xlu1 %581 }
 0x1c8   : > { %v626_v25 = vadd.f32 %v604_v7, %v576_v19  ;;  %v1494_v26 = vmax.f32 %v643_v17, 0.0  ;;  %v628_v29 = vadd.f32 %v611_v9, %v582_v23  ;;  %v1499_v30 = vmax.f32 %v645_v18, 0.0 }
 0x1ca   : > { %v642_v32 = vsub.f32 %v626_v25, %v634_v22  ;;  %v661_v28 = vsel %vm573_vm4, %v1494_v26, 0.0  ;;  %v644_v33 = vsub.f32 %v628_v29, %v636_v27  ;;  %v667_v44 = vsel %vm573_vm4, %v1499_v30, 0.0 }
 0x1cb   : > { %662 = vadd.xlane.f32.xlu1 %v661_v28  ;;  %v591_v37 = vpop.xlane.xlu1 %590 }
 0x1cc   : > { %v588_v38 = vpop.xlane.xlu0 %587  ;;  %v1501_v31 = vmax.f32 %v642_v32, 0.0  ;;  %v631_v41 = vadd.f32 %v618_v35, %v591_v37  ;;  %v1508_v47 = vmax.f32 %v644_v33, 0.0 }
 0x1cd   : > { %v630_v34 = vadd.f32 %v618_v35, %v588_v38 }
 0x1ce   : > { %v658_v46 = vsel %vm573_vm4, %v1501_v31, 0.0  ;;  %v647_v49 = vsub.f32 %v631_v41, %v639_v39  ;;  %v664_v57 = vsel %vm573_vm4, %v1508_v47, 0.0 }
 0x1cf   : > { %v646_v50 = vsub.f32 %v630_v34, %v638_v40  ;;  %668 = vadd.xlane.f32.xlu1 %v667_v44  ;;  %659 = vadd.xlane.f32.xlu0 %v658_v46  ;;  %v597_v53 = vpop.xlane.xlu1 %596  ;;  %v723_v46 = vsub.f32 0.0, %v1494_v26 }
 0x1d0   : > { %v594_v42 = vpop.xlane.xlu0 %593  ;;  %v633_v54 = vadd.f32 %v625_v51, %v597_v53  ;;  %v1512_v56 = vmax.f32 %v647_v49, 0.0  ;;  %v722_v49 = vsub.f32 0.0, %v1501_v31 }
 0x1d1   : > { %v632_v55 = vadd.f32 %v625_v51, %v594_v42  ;;  %v1516_v58 = vmax.f32 %v646_v50, 0.0 }
 0x1d2   : > { %v649_v59 = vsub.f32 %v633_v54, %v641_v52  ;;  %v673_v61 = vsel %vm573_vm4, %v1512_v56, 0.0  ;;  %v724_v54 = vsub.f32 0.0, %v1508_v47  ;;  %v727_v26 = vsub.f32 0.0, %v1512_v56 }
 0x1d3   : > { %v648_v60 = vsub.f32 %v632_v55, %v640_v45  ;;  %665 = vadd.xlane.f32.xlu0 %v664_v57  ;;  %674 = vadd.xlane.f32.xlu1 %v673_v61  ;;  %v670_v48 = vsel %vm573_vm4, %v1516_v58, 0.0  ;;  %v725_v45 = vsub.f32 0.0, %v1499_v30  ;;  %v726_v31 = vsub.f32 0.0, %v1516_v58 }
 0x1d4   : > { %v1520_v43 = vmax.f32 %v649_v59, 0.0 }
 0x1d5   : > { %v1524_v62 = vmax.f32 %v648_v60, 0.0 }
 0x1d6   : > { %v679_v63 = vsel %vm573_vm4, %v1520_v43, 0.0 }
 0x1d7   : > { %671 = vadd.xlane.f32.xlu0 %v670_v48  ;;  %680 = vadd.xlane.f32.xlu1 %v679_v63  ;;  %v676_v0 = vsel %vm573_vm4, %v1524_v62, 0.0 }
 0x1db   : > { %677 = vadd.xlane.f32.xlu0 %v676_v0 }
 0x258   : > { %v663_v1 = vpop.xlane.xlu1 %662 }
 0x25c   : > { %v669_v2 = vpop.xlane.xlu1 %668  ;;  %v660_v3 = vpop.xlane.xlu0 %659 }
 0x25d   : > { %v682_v4 = vadd.f32 %v663_v1, %v660_v3 }
 0x25f   : > { %v683_v5 = vrot.slane %v682_v4, 4 }
 0x260   : > { %v666_v6 = vpop.xlane.xlu0 %665  ;;  %v675_v9 = vpop.xlane.xlu1 %674 }
 0x261   : > { %v684_v7 = vadd.f32 %v683_v5, %v682_v4  ;;  %v689_v8 = vadd.f32 %v669_v2, %v666_v6  ;;  %v729_v5 = vsub.f32 0.0, %v1520_v43  ;;  %v728_v6 = vsub.f32 0.0, %v1524_v62 }
 0x263   : > { %v685_v10 = vrot.slane %v684_v7, 2  ;;  %v690_v11 = vrot.slane %v689_v8, 4 }
 0x264   : > { %v672_v12 = vpop.xlane.xlu0 %671  ;;  %v681_v19 = vpop.xlane.xlu1 %680 }
 0x265   : > { %v686_v13 = vadd.f32 %v685_v10, %v684_v7  ;;  %v691_v14 = vadd.f32 %v690_v11, %v689_v8  ;;  %v696_v15 = vadd.f32 %v675_v9, %v672_v12 }
 0x267   : > { %v687_v16 = vrot.slane %v686_v13, 1  ;;  %v692_v17 = vrot.slane %v691_v14, 2  ;;  %v697_v18 = vrot.slane %v696_v15, 4 }
 0x268   : > { %v678_v20 = vpop.xlane.xlu0 %677 }
 0x269   : > { %v688_v21 = vadd.f32 %v687_v16, %v686_v13  ;;  %v693_v22 = vadd.f32 %v692_v17, %v691_v14  ;;  %v698_v23 = vadd.f32 %v697_v18, %v696_v15  ;;  %v703_v25 = vadd.f32 %v681_v19, %v678_v20 }
 0x26a   : > { %v1263_v19 = vmov -1.0  }
 0x26b   : > { %1133 = vrcp.f32 %v688_v21  ;;  %v694_v27 = vrot.slane %v693_v22, 1  ;;  %v699_v29 = vrot.slane %v698_v23, 2  ;;  %v704_v32 = vrot.slane %v703_v25, 4 }
 0x26c   : > { %v1539_v20 = vsel %vm824_vm8, 1.0, %v1263_v19 }
 0x26d   : > { %v695_v28 = vadd.f32 %v694_v27, %v693_v22  ;;  %v700_v33 = vadd.f32 %v699_v29, %v698_v23  ;;  %v705_v35 = vadd.f32 %v704_v32, %v703_v25  ;;  %v1541_v29 = vsel %vm823_vm9, 1.0, %v1263_v19 }
 0x26f   : > { %1135 = vrcp.f32 %v695_v28  ;;  %v701_v36 = vrot.slane %v700_v33, 1  ;;  %v706_v37 = vrot.slane %v705_v35, 2 }
 0x271   : > { %v702_v38 = vadd.f32 %v701_v36, %v700_v33  ;;  %v707_v39 = vadd.f32 %v706_v37, %v705_v35 }
 0x273   : > { %1137 = vrcp.f32 %v702_v38  ;;  %v708_v40 = vrot.slane %v707_v39, 1 }
 0x275   : > { %v1134_v41 = vpop.eup %1133  ;;  %v709_v34 = vadd.f32 %v708_v40, %v707_v39 }
 0x276   : > { %v711_v44 = vmul.f32 960.0, %v1134_v41 }
 0x277   : > { %1139 = vrcp.f32 %v709_v34 }
 0x278   : > { %v718_v50 = vmul.f32 0.0625, %v711_v44 }
 0x279   : > { %v1136_v51 = vpop.eup %1135 }
 0x27a   : > { %v730_v52 = vmul.f32 %v722_v49, %v718_v50  ;;  %v731_v53 = vmul.f32 %v723_v46, %v718_v50  ;;  %v713_v42 = vmul.f32 960.0, %v1136_v51 }
 0x27c   : > { %v738_v55 = vmul.f32 1.442695, %v730_v52  ;;  %v740_v57 = vmul.f32 1.442695, %v731_v53  ;;  %v719_v59 = vmul.f32 0.0625, %v713_v42 }
 0x27d   : > { %v1138_v60 = vpop.eup %1137 }
 0x27e   : > { %1141 = vpow2.f32 %v738_v55  ;;  %v732_v61 = vmul.f32 %v724_v54, %v719_v59  ;;  %v733_v48 = vmul.f32 %v725_v45, %v719_v59  ;;  %v715_v63 = vmul.f32 960.0, %v1138_v60 }
 0x27f   : > { %1143 = vpow2.f32 %v740_v57 }
 0x280   : > { %v742_v0 = vmul.f32 1.442695, %v732_v61  ;;  %v744_v1 = vmul.f32 1.442695, %v733_v48  ;;  %v720_v2 = vmul.f32 0.0625, %v715_v63 }
 0x281   : > { %v1140_v3 = vpop.eup %1139 }
 0x282   : > { %1145 = vpow2.f32 %v742_v0  ;;  %v734_v30 = vmul.f32 %v726_v31, %v720_v2  ;;  %v735_v47 = vmul.f32 %v727_v26, %v720_v2  ;;  %v717_v4 = vmul.f32 960.0, %v1140_v3 }
 0x283   : > { %1147 = vpow2.f32 %v744_v1 }
 0x284   : > { %v746_v7 = vmul.f32 1.442695, %v734_v30  ;;  %v748_v8 = vmul.f32 1.442695, %v735_v47  ;;  %v721_v9 = vmul.f32 0.0625, %v717_v4 }
 0x286   : > { %1149 = vpow2.f32 %v746_v7  ;;  %v736_v56 = vmul.f32 %v728_v6, %v721_v9  ;;  %v737_v58 = vmul.f32 %v729_v5, %v721_v9 }
 0x287   : > { %1151 = vpow2.f32 %v748_v8 }
 0x288   : > { %v1142_v10 = vpop.eup %1141  ;;  %v750_v11 = vmul.f32 1.442695, %v736_v56  ;;  %v752_v12 = vmul.f32 1.442695, %v737_v58 }
 0x289   : > { %v1144_v13 = vpop.eup %1143  ;;  %v754_v14 = vmul.f32 %v1142_v10, %v1142_v10 }
 0x28a   : > { %1153 = vpow2.f32 %v750_v11  ;;  %v755_v43 = vmul.f32 %v1144_v13, %v1144_v13 }
 0x28b   : > { %1155 = vpow2.f32 %v752_v12  ;;  %v762_v62 = vadd.f32 %v1142_v10, %v754_v14  ;;  %v770_v15 = vmul.f32 %v754_v14, %v754_v14 }
 0x28c   : > { %v1146_v16 = vpop.eup %1145  ;;  %v763_v24 = vadd.f32 %v1144_v13, %v755_v43  ;;  %v771_v17 = vmul.f32 %v755_v43, %v755_v43 }
 0x28d   : > { %v1148_v18 = vpop.eup %1147  ;;  %v778_v21 = vadd.f32 %v770_v15, %v762_v62  ;;  %v786_v22 = vmul.f32 %v770_v15, %v770_v15  ;;  %v756_v23 = vmul.f32 %v1146_v16, %v1146_v16 }
 0x28e   : > { %v779_v25 = vadd.f32 %v771_v17, %v763_v24  ;;  %v787_v27 = vmul.f32 %v771_v17, %v771_v17  ;;  %v757_v32 = vmul.f32 %v1148_v18, %v1148_v18 }
 0x28f   : > { %v794_v28 = vadd.f32 %v786_v22, %v778_v21  ;;  %v802_v33 = vmul.f32 %v786_v22, %v786_v22  ;;  %v764_v35 = vadd.f32 %v1146_v16, %v756_v23  ;;  %v772_v36 = vmul.f32 %v756_v23, %v756_v23 }
 0x290   : > { %v1150_v37 = vpop.eup %1149  ;;  %v795_v38 = vadd.f32 %v787_v27, %v779_v25  ;;  %v803_v39 = vmul.f32 %v787_v27, %v787_v27  ;;  %v765_v40 = vadd.f32 %v1148_v18, %v757_v32  ;;  %v773_v41 = vmul.f32 %v757_v32, %v757_v32 }
 0x291   : > { %v1152_v34 = vpop.eup %1151  ;;  %v810_v44 = vadd.f32 %v802_v33, %v794_v28  ;;  %v780_v46 = vadd.f32 %v772_v36, %v764_v35  ;;  %v788_v49 = vmul.f32 %v772_v36, %v772_v36  ;;  %v758_v50 = vmul.f32 %v1150_v37, %v1150_v37 }
 0x292   : > { %v811_v51 = vadd.f32 %v803_v39, %v795_v38  ;;  %v781_v52 = vadd.f32 %v773_v41, %v765_v40  ;;  %v789_v53 = vmul.f32 %v773_v41, %v773_v41  ;;  %v759_v42 = vmul.f32 %v1152_v34, %v1152_v34 }
 0x293   : > { %v827_v45 = vmul.f32 %v1541_v29, %v810_v44  ;;  %v796_v54 = vadd.f32 %v788_v49, %v780_v46  ;;  %v804_v55 = vmul.f32 %v788_v49, %v788_v49  ;;  %v766_v57 = vadd.f32 %v1150_v37, %v758_v50 }
 0x294   : > { %v1154_v59 = vpop.eup %1153  ;;  %v828_v60 = vmul.f32 %v1539_v20, %v811_v51  ;;  %v797_v61 = vadd.f32 %v789_v53, %v781_v52  ;;  %v805_v48 = vmul.f32 %v789_v53, %v789_v53  ;;  %v767_v63 = vadd.f32 %v1152_v34, %v759_v42 }
 0x295   : > { %v1156_v26 = vpop.eup %1155  ;;  %v835_v31 = vsel %vm573_vm4, %v827_v45, 0.0  ;;  %v812_v0 = vadd.f32 %v804_v55, %v796_v54  ;;  %v775_v1 = vmul.f32 %v759_v42, %v759_v42  ;;  %v774_v2 = vmul.f32 %v758_v50, %v758_v50 }
 0x296   : > { %v838_v3 = vsel %vm573_vm4, %v828_v60, 0.0  ;;  %836 = vadd.xlane.f32.xlu0 %v835_v31  ;;  %v813_v30 = vadd.f32 %v805_v48, %v797_v61  ;;  %v761_v47 = vmul.f32 %v1156_v26, %v1156_v26  ;;  %v760_v4 = vmul.f32 %v1154_v59, %v1154_v59 }
 0x297   : > { %839 = vadd.xlane.f32.xlu1 %v838_v3  ;;  %v829_v5 = vmul.f32 %v1541_v29, %v812_v0  ;;  %v783_v6 = vadd.f32 %v775_v1, %v767_v63  ;;  %v791_v7 = vmul.f32 %v775_v1, %v775_v1  ;;  %v782_v8 = vadd.f32 %v774_v2, %v766_v57 }
 0x298   : > { %v830_v9 = vmul.f32 %v1539_v20, %v813_v30  ;;  %v790_v56 = vmul.f32 %v774_v2, %v774_v2  ;;  %v769_v58 = vadd.f32 %v1156_v26, %v761_v47  ;;  %v777_v10 = vmul.f32 %v761_v47, %v761_v47 }
 0x299   : > { %v841_v11 = vsel %vm573_vm4, %v829_v5, 0.0  ;;  %v799_v12 = vadd.f32 %v791_v7, %v783_v6  ;;  %v807_v13 = vmul.f32 %v791_v7, %v791_v7  ;;  %v768_v14 = vadd.f32 %v1154_v59, %v760_v4 }
 0x29a   : > { %v844_v43 = vsel %vm573_vm4, %v830_v9, 0.0  ;;  %842 = vadd.xlane.f32.xlu0 %v841_v11  ;;  %v798_v62 = vadd.f32 %v790_v56, %v782_v8  ;;  %v806_v15 = vmul.f32 %v790_v56, %v790_v56  ;;  %v785_v16 = vadd.f32 %v777_v10, %v769_v58 }
 0x29b   : > { %845 = vadd.xlane.f32.xlu1 %v844_v43  ;;  %v815_v24 = vadd.f32 %v807_v13, %v799_v12  ;;  %v793_v17 = vmul.f32 %v777_v10, %v777_v10  ;;  %v776_v18 = vmul.f32 %v760_v4, %v760_v4 }
 0x29c   : > { %v814_v19 = vadd.f32 %v806_v15, %v798_v62 }
 0x29d   : > { %v832_v21 = vmul.f32 %v1539_v20, %v815_v24  ;;  %v801_v22 = vadd.f32 %v793_v17, %v785_v16  ;;  %v809_v23 = vmul.f32 %v793_v17, %v793_v17  ;;  %v784_v25 = vadd.f32 %v776_v18, %v768_v14 }
 0x29e   : > { %v831_v27 = vmul.f32 %v1541_v29, %v814_v19  ;;  %v792_v32 = vmul.f32 %v776_v18, %v776_v18 }
 0x29f   : > { %v850_v28 = vsel %vm573_vm4, %v832_v21, 0.0  ;;  %v817_v33 = vadd.f32 %v809_v23, %v801_v22 }
 0x2a0   : > { %851 = vadd.xlane.f32.xlu1 %v850_v28  ;;  %v847_v35 = vsel %vm573_vm4, %v831_v27, 0.0  ;;  %v800_v36 = vadd.f32 %v792_v32, %v784_v25  ;;  %v808_v37 = vmul.f32 %v792_v32, %v792_v32 }
 0x2a1   : > { %848 = vadd.xlane.f32.xlu0 %v847_v35  ;;  %v834_v38 = vmul.f32 %v1539_v20, %v817_v33 }
 0x2a2   : > { %v816_v39 = vadd.f32 %v808_v37, %v800_v36 }
 0x2a3   : > { %v856_v40 = vsel %vm573_vm4, %v834_v38, 0.0 }
 0x2a4   : > { %857 = vadd.xlane.f32.xlu1 %v856_v40  ;;  %v833_v41 = vmul.f32 %v1541_v29, %v816_v39 }
 0x2a6   : > { %v853_v34 = vsel %vm573_vm4, %v833_v41, 0.0 }
 0x2a7   : > { %854 = vadd.xlane.f32.xlu0 %v853_v34 }
 0x323   : > { %v837_v44 = vpop.xlane.xlu0 %836 }
 0x324   : > { %v840_v46 = vpop.xlane.xlu1 %839 }
 0x325   : > { %v859_v49 = vadd.f32 %v840_v46, %v837_v44 }
 0x327   : > { %v860_v50 = vrot.slane %v859_v49, 4  ;;  %v843_v51 = vpop.xlane.xlu0 %842 }
 0x328   : > { %v846_v52 = vpop.xlane.xlu1 %845 }
 0x329   : > { %v861_v53 = vadd.f32 %v860_v50, %v859_v49  ;;  %v866_v42 = vadd.f32 %v846_v52, %v843_v51 }
 0x32b   : > { %v862_v20 = vrot.slane %v861_v53, 2  ;;  %v867_v45 = vrot.slane %v866_v42, 4 }
 0x32d   : > { %v863_v54 = vadd.f32 %v862_v20, %v861_v53  ;;  %v868_v55 = vadd.f32 %v867_v45, %v866_v42  ;;  %v852_v57 = vpop.xlane.xlu1 %851 }
 0x32e   : > { %v849_v29 = vpop.xlane.xlu0 %848 }
 0x32f   : > { %v864_v59 = vrot.slane %v863_v54, 1  ;;  %v869_v60 = vrot.slane %v868_v55, 2  ;;  %v873_v61 = vadd.f32 %v852_v57, %v849_v29 }
 0x331   : > { %v865_v48 = vadd.f32 %v864_v59, %v863_v54  ;;  %v870_v63 = vadd.f32 %v869_v60, %v868_v55  ;;  %v874_v26 = vrot.slane %v873_v61, 4  ;;  %v858_v31 = vpop.xlane.xlu1 %857 }
 0x333   : > { %v887_v0 = vmul.f32 0.015625, %v865_v48  ;;  %v871_v1 = vrot.slane %v870_v63, 1  ;;  %v875_v2 = vadd.f32 %v874_v26, %v873_v61 }
 0x334   : > { %v855_v3 = vpop.xlane.xlu0 %854 }
 0x335   : > { %892 = vst.msk [vmem:[%s203_s16] sm:$0x1] %vm891_vm10, %v887_v0  ;;  %v872_v30 = vadd.f32 %v871_v1, %v870_v63  ;;  %v876_v47 = vrot.slane %v875_v2, 2  ;;  %v880_v4 = vadd.f32 %v858_v31, %v855_v3 }
 0x337   : > { %v888_v5 = vmul.f32 0.015625, %v872_v30  ;;  %v877_v6 = vadd.f32 %v876_v47, %v875_v2  ;;  %v881_v7 = vrot.slane %v880_v4, 4 }
 0x339   : > { %893 = vst.msk [vmem:[%s203_s16 + $0x1] sm:$0x1] %vm891_vm10, %v888_v5  ;;  %v878_v8 = vrot.slane %v877_v6, 1  ;;  %v882_v9 = vadd.f32 %v881_v7, %v880_v4 }
 0x33b   : > { %v879_v56 = vadd.f32 %v878_v8, %v877_v6  ;;  %v883_v58 = vrot.slane %v882_v9, 2 }
 0x33d   : > { %v889_v10 = vmul.f32 0.015625, %v879_v56  ;;  %v884_v11 = vadd.f32 %v883_v58, %v882_v9 }
 0x33f   : > { %894 = vst.msk [vmem:[%s203_s16 + $0x2] sm:$0x1] %vm891_vm10, %v889_v10  ;;  %v885_v12 = vrot.slane %v884_v11, 1 }
 0x341   : > { %v886_v13 = vadd.f32 %v885_v12, %v884_v11 }
 0x343   : > { %v890_v14 = vmul.f32 0.015625, %v886_v13 }
 0x345   : > { %895 = vst.msk [vmem:[%s203_s16 + $0x3] sm:$0x1] %vm891_vm10, %v890_v14 }
 0x346 PF: > { %p15_p11 = scmp.ge.s32.totalorder %s1299_s14, 4   ;;  %s1592_s9 = smov %s1247_s10 }
 0x347   : > { %s1593_s10 = smov %s1251_s11  ;;  %s1594_s11 = smov %s1309_s17 }
 0x348   : > { %s1595_s12 = smov %s1299_s14  ;;  %17 = sbr.rel (!%p15_p11) target bundleno = 5 (0x5), region = 81 }
 0x34f   :  { %916 = vsyncpa [#allocation4], 1 }
 0x350   :  { %918 = vsyncpa [#allocation4 + $0x1], 1 }
 0x351   :  { %919 = vsyncpa [#allocation6], 1 }
 0x352   :  { %921 = vsyncpa [#allocation6 + $0x1], 1 }

</bundles_post_ra>
